<compile_context>
chip_gen: v6e
topology: v6e:2x2x1
jax: 0.10.0
libtpu: 0.0.40
codegen_flags: <defaults>
</compile_context>

<pallas_src>
import jax
import jax.numpy as jnp
from jax.experimental import pallas as pl
from jax.experimental.pallas import tpu as pltpu

LANE = 128
SUBLANE = 8
FUSED_WEIGHT_BUDGET = 20 * 1024 * 1024  # bytes of bf16 W + f32 b below which we fully fuse


def _round_up(n, m):
    return ((n + m - 1) // m) * m


def init_params(key, sizes):
    """Deterministic init mimicking PyTorch nn.Linear default (U(-1/sqrt(fan_in), +))."""
    params = []
    for i in range(len(sizes) - 1):
        fan_in, fan_out = sizes[i], sizes[i + 1]
        key, kw, kb = jax.random.split(key, 3)
        bound = 1.0 / float(fan_in) ** 0.5
        # Stored in PyTorch convention: (out_features, in_features)
        w = jax.random.uniform(kw, (fan_out, fan_in), jnp.float32, -bound, bound)
        b = jax.random.uniform(kb, (fan_out,), jnp.float32, -bound, bound)
        params.append((w, b))
    return params


def prepare_params(params):
    """One-time prep: transpose to (in, out), zero-pad feature dims to lane multiples,
    store weights in bf16 (MXU-native) and biases in f32 (epilogue stays f32)."""
    prepped = []
    for (w, b) in params:                       # w: (out, in) PyTorch convention
        out_f, in_f = w.shape
        in_p = _round_up(in_f, LANE)
        out_p = _round_up(out_f, LANE)
        w_t = jnp.zeros((in_p, out_p), jnp.bfloat16).at[:in_f, :out_f].set(
            w.T.astype(jnp.bfloat16))
        b_r = jnp.zeros((1, out_p), jnp.float32).at[:, :out_f].set(b.astype(jnp.float32))
        prepped.append((w_t, b_r))
    return prepped


# ----------------------------- fused (all layers, one call) ----------------------------- #

def _make_fused_mlp_kernel(n_layers):
    """h = relu(...relu(relu(x @ W0 + b0) @ W1 + b1)...) entirely in VMEM."""

    def kernel(*refs):
        # refs = (x_ref, w0_ref, b0_ref, w1_ref, b1_ref, ..., o_ref)
        x_ref = refs[0]
        o_ref = refs[-1]
        h = x_ref[...]
        for i in range(n_layers):                     # static unroll over layers
            w_ref = refs[1 + 2 * i]
            b_ref = refs[2 + 2 * i]
            y = jnp.dot(h.astype(jnp.bfloat16), w_ref[...],
                        preferred_element_type=jnp.float32)   # bf16 x bf16 -> f32 (MXU)
            h = jnp.maximum(y + b_ref[...], 0.0)               # bias + ReLU in f32 (VPU)
        o_ref[...] = h.astype(o_ref.dtype)

    return kernel


# ----------------------------- tiled per-layer fallback --------------------------------- #

def _tiled_linear_relu_kernel(x_ref, w_ref, b_ref, o_ref, acc_ref):
    @pl.when(pl.program_id(2) == 0)
    def _():
        acc_ref[...] = jnp.zeros_like(acc_ref)

    acc_ref[...] += jnp.dot(x_ref[...].astype(jnp.bfloat16), w_ref[...],
                            preferred_element_type=jnp.float32)

    @pl.when(pl.program_id(2) == pl.num_programs(2) - 1)
    def _():
        o_ref[...] = jnp.maximum(acc_ref[...] + b_ref[...], 0.0).astype(o_ref.dtype)


def _tiled_linear_relu(x, w, b, out_dtype):
    """One Linear+ReLU as a (M, N, K)-gridded matmul with an f32 VMEM accumulator."""
    M, K = x.shape
    Kw, N = w.shape
    assert K == Kw
    tm = min(M, 128)
    tk = 256 if K % 256 == 0 else 128      # 256-wide tiles fill v6e/v7x MXU; 128 for v5e dims
    tn = 256 if N % 256 == 0 else 128
    grid = (M // tm, N // tn, K // tk)

    out_isize = jnp.dtype(out_dtype).itemsize
    flops = 2 * M * N * K
    bytes_accessed = (x.size * x.dtype.itemsize + w.size * 2 + b.size * 4 + M * N * out_isize)
    vmem_need = (2 * (tm * tk * x.dtype.itemsize + tk * tn * 2 + tn * 4 + tm * tn * out_isize)
                 + tm * tn * 4 + (4 << 20))
    vmem_limit = min(max(vmem_need, 32 << 20), 64 << 20)

    return pl.pallas_call(
        _tiled_linear_relu_kernel,
        out_shape=jax.ShapeDtypeStruct((M, N), out_dtype),
        grid_spec=pltpu.PrefetchScalarGridSpec(
            num_scalar_prefetch=0,
            grid=grid,
            in_specs=[pl.BlockSpec((tm, tk), lambda i, j, k: (i, k)),
                      pl.BlockSpec((tk, tn), lambda i, j, k: (k, j)),
                      pl.BlockSpec((1, tn), lambda i, j, k: (0, j))],
            out_specs=pl.BlockSpec((tm, tn), lambda i, j, k: (i, j)),
            scratch_shapes=[pltpu.VMEM((tm, tn), jnp.float32)]),
        compiler_params=pltpu.CompilerParams(
            dimension_semantics=("parallel", "parallel", "arbitrary"),
            vmem_limit_bytes=vmem_limit),
        cost_estimate=pl.CostEstimate(flops=flops, transcendentals=0,
                                      bytes_accessed=bytes_accessed),
    )(x, w, b)


# ------------------------------------ forward ------------------------------------------- #

def make_forward(sizes, *, force_tiled=False):
    """Build a jitted forward: x:(B, sizes[0]) -> (B, sizes[-1])."""
    n_layers = len(sizes) - 1
    in_dim, out_dim = sizes[0], sizes[-1]
    padded = [_round_up(s, LANE) for s in sizes]
    weight_bytes = sum(padded[i] * padded[i + 1] * 2 + padded[i + 1] * 4
                       for i in range(n_layers))
    use_fused = (not force_tiled) and weight_bytes <= FUSED_WEIGHT_BUDGET
    fused_kernel = _make_fused_mlp_kernel(n_layers)

    def forward(x, prepped):
        orig_dtype = x.dtype
        batch = x.shape[0]
        in_p = prepped[0][0].shape[0]
        out_p = prepped[-1][0].shape[1]
        b_p = _round_up(batch, SUBLANE) if batch <= 128 else _round_up(batch, 128)
        tb = min(b_p, 128)

        # Pad (and fold in the bf16 cast) only when not already aligned; zero padding is
        # exact because padded weight rows/cols and padded bias entries are exactly zero.
        if b_p != batch or in_p != in_dim:
            x_in = jnp.zeros((b_p, in_p), jnp.bfloat16).at[:batch, :in_dim].set(
                x.astype(jnp.bfloat16))
        else:
            x_in = x   # kernel casts to bf16 in VMEM; avoids an extra HBM round trip

        if use_fused:
            flat_wb = []
            in_specs = [pl.BlockSpec((tb, in_p), lambda i: (i, 0))]
            for (w, b) in prepped:
                kp, np_ = w.shape
                in_specs.append(pl.BlockSpec((kp, np_), lambda i: (0, 0)))   # VMEM-resident
                in_specs.append(pl.BlockSpec((1, np_), lambda i: (0, 0)))
                flat_wb.extend((w, b))
            out_specs = pl.BlockSpec((tb, out_p), lambda i: (i, 0))

            wb_bytes = sum(w.size * 2 + b.size * 4 for w, b in prepped)
            flops = 2 * b_p * sum(w.shape[0] * w.shape[1] for w, _ in prepped)
            bytes_accessed = (x_in.size * x_in.dtype.itemsize + wb_bytes
                              + b_p * out_p * orig_dtype.itemsize)
            max_feat = max(w.shape[1] for w, _ in prepped)
            vmem_need = (2 * (tb * in_p * x_in.dtype.itemsize + tb * out_p * 4)
                         + wb_bytes
                         + 6 * tb * max_feat * 4        # headroom for f32/bf16 temporaries
                         + (2 << 20))
            vmem_limit = min(max(vmem_need, 32 << 20), 64 << 20)

            y_pad = pl.pallas_call(
                fused_kernel,
                out_shape=jax.ShapeDtypeStruct((b_p, out_p), orig_dtype),
                grid_spec=pltpu.PrefetchScalarGridSpec(
                    num_scalar_prefetch=0,
                    grid=(b_p // tb,),
                    in_specs=in_specs,
                    out_specs=out_specs),
                compiler_params=pltpu.CompilerParams(
                    dimension_semantics=("parallel",),   # lets v7x split batch over 2 TCs
                    vmem_limit_bytes=vmem_limit),
                cost_estimate=pl.CostEstimate(flops=flops, transcendentals=0,
                                              bytes_accessed=bytes_accessed),
            )(x_in, *flat_wb)
        else:
            h = x_in
            for li, (w, b) in enumerate(prepped):
                last = li == n_layers - 1
                h = _tiled_linear_relu(h, w, b, orig_dtype if last else jnp.bfloat16)
            y_pad = h

        if b_p != batch or out_p != out_dim:
            return y_pad[:batch, :out_dim]
        return y_pad

    return jax.jit(forward)


def reference_forward(x, params):
    """Pure-JAX reference matching the kernels' bf16-matmul / f32-epilogue numerics."""
    h = x.astype(jnp.float32)
    for (w, b) in params:
        a = h.astype(jnp.bfloat16).astype(jnp.float32)
        wt = w.T.astype(jnp.bfloat16).astype(jnp.float32)
        h = jnp.maximum(jnp.dot(a, wt, precision=jax.lax.Precision.HIGHEST) + b, 0.0)
    return h


if __name__ == "__main__":
    key = jax.random.PRNGKey(0)

    # --- Test 1: small MLP -> single fused, VMEM-resident kernel ------------------------- #
    sizes = [64, 128, 32]
    batch = 8
    key, kx, kp = jax.random.split(key, 3)
    x = jax.random.normal(kx, (batch, sizes[0]), dtype=jnp.float32)
    params = init_params(kp, sizes)
    prepped = prepare_params(params)
    forward = make_forward(sizes)
    y = forward(x, prepped)
    jax.block_until_ready(y)
    ref = reference_forward(x, params)
    assert y.shape == (batch, sizes[-1])
    assert jnp.allclose(y, ref, atol=2e-2, rtol=2e-2), float(jnp.max(jnp.abs(y - ref)))

    # --- Test 2: force the (M, N, K)-gridded path (used when weights exceed VMEM budget) - #
    sizes2 = [300, 300, 10]
    batch2 = 24
    key, kx2, kp2 = jax.random.split(key, 3)
    x2 = jax.random.normal(kx2, (batch2, sizes2[0]), dtype=jnp.float32)
    params2 = init_params(kp2, sizes2)
    prepped2 = prepare_params(params2)
    forward2 = make_forward(sizes2, force_tiled=True)
    y2 = forward2(x2, prepped2)
    jax.block_until_ready(y2)
    ref2 = reference_forward(x2, params2)
    assert y2.shape == (batch2, sizes2[-1])
    assert jnp.allclose(y2, ref2, atol=2e-2, rtol=2e-2), float(jnp.max(jnp.abs(y2 - ref2)))

    print("KERNEL_OK")
</pallas_src>

<mosaic_0001>
module attributes {stable_mosaic.version = 11 : i64} {
  func.func @kernel(%arg0: i32, %arg1: memref<8x128xbf16, #tpu.memory_space<vmem>>, %arg2: memref<128x128xbf16, #tpu.memory_space<vmem>>, %arg3: memref<1x128xf32, #tpu.memory_space<vmem>>, %arg4: memref<128x128xbf16, #tpu.memory_space<vmem>>, %arg5: memref<1x128xf32, #tpu.memory_space<vmem>>, %arg6: memref<8x128xf32, #tpu.memory_space<vmem>>) attributes {dimension_semantics = [#tpu.dimension_semantics<parallel>], iteration_bounds = array<i64: 1>, scalar_prefetch = 0 : i64, scratch_operands = 0 : i64, tpu.core_type = #tpu.core_type<tc>, window_params = [{transform_indices = @transform_0, window_bounds = array<i64: 8, 128>}, {pipeline_mode = #tpu.pipeline_mode<synchronous>, transform_indices = @transform_1, window_bounds = array<i64: 128, 128>}, {pipeline_mode = #tpu.pipeline_mode<synchronous>, transform_indices = @transform_2, window_bounds = array<i64: 1, 128>}, {pipeline_mode = #tpu.pipeline_mode<synchronous>, transform_indices = @transform_3, window_bounds = array<i64: 128, 128>}, {pipeline_mode = #tpu.pipeline_mode<synchronous>, transform_indices = @transform_4, window_bounds = array<i64: 1, 128>}, {transform_indices = @transform_5, window_bounds = array<i64: 8, 128>}]} {
    %c0 = arith.constant 0 : index
    %c0_0 = arith.constant 0 : index
    %0 = vector.load %arg1[%c0, %c0_0] : memref<8x128xbf16, #tpu.memory_space<vmem>>, vector<8x128xbf16>
    %c0_1 = arith.constant 0 : index
    %c0_2 = arith.constant 0 : index
    %1 = vector.load %arg2[%c0_1, %c0_2] : memref<128x128xbf16, #tpu.memory_space<vmem>>, vector<128x128xbf16>
    %cst = arith.constant dense<0.000000e+00> : vector<8x128xf32>
    %2 = tpu.matmul %0, %1, %cst {dimension_numbers = #tpu.dot_dimension_numbers<[1], [0], [0], [1], [0, 0, 1, 1], [], []>} : vector<8x128xbf16>, vector<128x128xbf16>, vector<8x128xf32> -> vector<8x128xf32>
    %c0_3 = arith.constant 0 : index
    %c0_4 = arith.constant 0 : index
    %3 = vector.load %arg3[%c0_3, %c0_4] : memref<1x128xf32, #tpu.memory_space<vmem>>, vector<1x128xf32>
    %4 = vector.broadcast %3 : vector<1x128xf32> to vector<8x128xf32>
    %5 = arith.addf %2, %4 : vector<8x128xf32>
    %cst_5 = arith.constant 0.000000e+00 : f32
    %6 = vector.broadcast %cst_5 : f32 to vector<8x128xf32>
    %7 = arith.maximumf %5, %6 : vector<8x128xf32>
    %8 = arith.truncf %7 : vector<8x128xf32> to vector<8x128xbf16>
    %c0_6 = arith.constant 0 : index
    %c0_7 = arith.constant 0 : index
    %9 = vector.load %arg4[%c0_6, %c0_7] : memref<128x128xbf16, #tpu.memory_space<vmem>>, vector<128x128xbf16>
    %cst_8 = arith.constant dense<0.000000e+00> : vector<8x128xf32>
    %10 = tpu.matmul %8, %9, %cst_8 {dimension_numbers = #tpu.dot_dimension_numbers<[1], [0], [0], [1], [0, 0, 1, 1], [], []>} : vector<8x128xbf16>, vector<128x128xbf16>, vector<8x128xf32> -> vector<8x128xf32>
    %c0_9 = arith.constant 0 : index
    %c0_10 = arith.constant 0 : index
    %11 = vector.load %arg5[%c0_9, %c0_10] : memref<1x128xf32, #tpu.memory_space<vmem>>, vector<1x128xf32>
    %12 = vector.broadcast %11 : vector<1x128xf32> to vector<8x128xf32>
    %13 = arith.addf %10, %12 : vector<8x128xf32>
    %cst_11 = arith.constant 0.000000e+00 : f32
    %14 = vector.broadcast %cst_11 : f32 to vector<8x128xf32>
    %15 = arith.maximumf %13, %14 : vector<8x128xf32>
    %c0_12 = arith.constant 0 : index
    %c0_13 = arith.constant 0 : index
    %16 = vector.load %arg6[%c0_12, %c0_13] : memref<8x128xf32, #tpu.memory_space<vmem>>, vector<8x128xf32>
    tpu.vector_store %arg6[%c0_12, %c0_13], %15 {strides = array<i32>} : memref<8x128xf32, #tpu.memory_space<vmem>>, vector<8x128xf32>,
    return
  }
  func.func @transform_0(%arg0: i32) -> (i32, i32) {
    %c0_i32 = arith.constant 0 : i32
    %c0_i32_0 = arith.constant 0 : i32
    return %arg0, %c0_i32 : i32, i32
  }
  func.func @transform_1(%arg0: i32) -> (i32, i32) {
    %c0_i32 = arith.constant 0 : i32
    %c0_i32_0 = arith.constant 0 : i32
    %c0_i32_1 = arith.constant 0 : i32
    return %c0_i32, %c0_i32_0 : i32, i32
  }
  func.func @transform_2(%arg0: i32) -> (i32, i32) {
    %c0_i32 = arith.constant 0 : i32
    %c0_i32_0 = arith.constant 0 : i32
    %c0_i32_1 = arith.constant 0 : i32
    return %c0_i32, %c0_i32_0 : i32, i32
  }
  func.func @transform_3(%arg0: i32) -> (i32, i32) {
    %c0_i32 = arith.constant 0 : i32
    %c0_i32_0 = arith.constant 0 : i32
    %c0_i32_1 = arith.constant 0 : i32
    return %c0_i32, %c0_i32_0 : i32, i32
  }
  func.func @transform_4(%arg0: i32) -> (i32, i32) {
    %c0_i32 = arith.constant 0 : i32
    %c0_i32_0 = arith.constant 0 : i32
    %c0_i32_1 = arith.constant 0 : i32
    return %c0_i32, %c0_i32_0 : i32, i32
  }
  func.func @transform_5(%arg0: i32) -> (i32, i32) {
    %c0_i32 = arith.constant 0 : i32
    %c0_i32_0 = arith.constant 0 : i32
    return %arg0, %c0_i32 : i32, i32
  }
}

</mosaic_0001>

<bundles_post_ra>
// kernel: forward.1
= control target key start
LH: loop header
LB: loop body
LE: loop exit
PB: predicated region body
PF: predicated region fallthrough
CT: control target
= control target key end

     0   :  { %10 = vsyncpa [#allocation3], 0  ;;  %s513_s0 = inlined_call_operand.vmem [shape: bf16[8,128], index: 0, kind: input, shape index: {}]   ;;  %s514_s1 = inlined_call_operand.hbm [shape: bf16[128,128], index: 1, kind: input, shape index: {}]   ;;  %s515_s2 = inlined_call_operand.vmem [shape: f32[1,128], index: 2, kind: input, shape index: {}]   ;;  %s516_s3 = inlined_call_operand.hbm [shape: bf16[128,128], index: 3, kind: input, shape index: {}]   ;;  %s517_s4 = inlined_call_operand.vmem [shape: f32[1,128], index: 4, kind: input, shape index: {}]   ;;  %s518_s5 = inlined_call_operand.hbm [shape: f32[8,128], index: 5, kind: output, shape index: {}]  }
   0x1   :  { %11 = vsyncpa [#allocation6], 0 }
   0x2   :  { %12 = vsyncpa [#allocation4], 0  ;;  %s458_s18 = smov [#allocation2]  }
   0x3   :  { %s20_s19 = sshll.u32 %s458_s18, 4  ;;  %s21_s19 = int_to_ptr.vmem [resolvable:$true] %s20_s19 }
   0x4   :  { %s400_s20 = scalar_lea.vmem %s21_s19, 1024  ;;  %p405_p1 = scmp.lt.s32.totalorder %s21_s19, %s21_s19 }
   0x5   :  { %p401_p0 = scmp.ne.s32.totalorder %s21_s19, %s400_s20  ;;  %p406_p2 = scmp.lt.s32.totalorder %s400_s20, %s400_s20 }
   0x7   :  { %p407_p3 = por %p406_p2, %p405_p1 }
   0x9   :  { %p408_p4 = pnand %p407_p3, %p401_p0 }
   0xb   :  { %411 = shalt.err (!%p408_p4)
}
   0xc   :  { %s459_s21 = smov 64   ;;  %s460_s22 = smov 4  }
   0xd   :  { %26 = dma.hbm_to_vmem [thread:$0]  %s514_s1, 1024, %s21_s19, [#allocation3], %s459_s21, %s459_s21, %s460_s22  }
   0xe   :  { %s461_s25 = smov [#allocation5]  }
   0xf   :  { %s34_s26 = sshll.u32 %s461_s25, 4  ;;  %s35_s26 = int_to_ptr.vmem [resolvable:$true] %s34_s26 }
  0x10   :  { %s420_s27 = scalar_lea.vmem %s35_s26, 1024  ;;  %p425_p6 = scmp.lt.s32.totalorder %s35_s26, %s35_s26 }
  0x11   :  { %p421_p5 = scmp.ne.s32.totalorder %s35_s26, %s420_s27  ;;  %p426_p7 = scmp.lt.s32.totalorder %s420_s27, %s420_s27 }
  0x13   :  { %p427_p8 = por %p426_p7, %p425_p6 }
  0x15   :  { %p428_p9 = pnand %p427_p8, %p421_p5 }
  0x17   :  { %431 = shalt.err (!%p428_p9)
}
  0x18   :  { %40 = dma.hbm_to_vmem [thread:$0]  %s516_s3, 1024, %s35_s26, [#allocation6], %s459_s21, %s459_s21, %s460_s22  }
  0x19   :  { %452 = dma.done.wait [#allocation3], 1024  }
  0x1a   :  { %453 = vsyncadd [#allocation3], 4294966272 }
  0x1b   :  { %454 = dma.done.wait [#allocation6], 1024  }
  0x1c   :  { %455 = vsyncadd [#allocation6], 4294966272  ;;  %v462_v0 = vmov 0.0   ;;  %vm463_vm0 = vmmov 0   ;;  %v376_v1 = vld [vmem:[#allocation2 + $0x38] sm:$0xff]   ;;  %v377_v2 = vld [vmem:[#allocation2 + $0x30] sm:$0xff]  }
  0x1d   :  { %329 = vmatprep.subr.bf16.mxu0 %v462_v0  ;;  %345 = vmatprep.mubr.msk.bf16.mxu0 %vm463_vm0, %v462_v0  ;;  %v378_v3 = vld [vmem:[#allocation2 + $0x28] sm:$0xff]   ;;  %v384_v4 = vld [vmem:[#allocation5 + $0x38] sm:$0xff]   ;;  %v379_v5 = vld [vmem:[#allocation2 + $0x20] sm:$0xff]   ;;  %s464_s8 = smov [#allocation7]  }
  0x1e   :  { %349 = vmatprep.subr.bf16.mxu1 %v462_v0  ;;  %365 = vmatprep.mubr.msk.bf16.mxu1 %vm463_vm0, %v462_v0  ;;  %v385_v6 = vld [vmem:[#allocation5 + $0x30] sm:$0xff]   ;;  %v380_v7 = vld [vmem:[#allocation2 + $0x18] sm:$0xff]   ;;  %v386_v8 = vld [vmem:[#allocation5 + $0x28] sm:$0xff]   ;;  %s283_s9 = sshll.u32 %s464_s8, 4  ;;  %s284_s9 = int_to_ptr.vmem [resolvable:$true] %s283_s9 }
  0x1f   :  { %330 = vmatpush3.bf16.msra.mxu0 %v376_v1  ;;  %350 = vmatpush3.bf16.msra.mxu1 %v384_v4  ;;  %v381_v9 = vld [vmem:[#allocation2 + $0x10] sm:$0xff]   ;;  %v387_v10 = vld [vmem:[#allocation5 + $0x20] sm:$0xff]   ;;  %v382_v11 = vld [vmem:[#allocation2 + $0x8] sm:$0xff]   ;;  %p437_p11 = scmp.lt.s32.totalorder %s284_s9, %s284_s9 }
  0x20   :  { %331 = vmatprep.subr.bf16.mxu0 %v462_v0  ;;  %351 = vmatprep.subr.bf16.mxu1 %v462_v0  ;;  %v388_v12 = vld [vmem:[#allocation5 + $0x18] sm:$0xff]   ;;  %v383_v13 = vld [vmem:[#allocation2] sm:$0xff]   ;;  %v389_v14 = vld [vmem:[#allocation5 + $0x10] sm:$0xff]  }
  0x21   :  { %v50_v15 = vld [vmem:[%s513_s0] sm:$0xf]  ;;  %v390_v16 = vld [vmem:[#allocation5 + $0x8] sm:$0xff]  }
  0x22   :  { %v391_v17 = vld [vmem:[#allocation5] sm:$0xff]  }
  0x23   :  { %332 = vmatpush3.bf16.msra.mxu0 %v377_v2  ;;  %352 = vmatpush3.bf16.msra.mxu1 %v385_v6  ;;  %v293_v18 = vld [vmem:[%s515_s2] ss:$0 sm:$0xff]  ;;  %s432_s2 = scalar_lea.vmem %s284_s9, 128 }
  0x24   :  { %333 = vmatprep.subr.bf16.mxu0 %v462_v0  ;;  %353 = vmatprep.subr.bf16.mxu1 %v462_v0  ;;  %v302_v26 = vld [vmem:[%s517_s4] ss:$0 sm:$0xff]  ;;  %p433_p10 = scmp.ne.s32.totalorder %s284_s9, %s432_s2  ;;  %p438_p12 = scmp.lt.s32.totalorder %s432_s2, %s432_s2 }
  0x26   :  { %p439_p13 = por %p438_p12, %p437_p11 }
  0x27   :  { %334 = vmatpush3.bf16.msra.mxu0 %v378_v3  ;;  %354 = vmatpush3.bf16.msra.mxu1 %v386_v8 }
  0x28   :  { %335 = vmatprep.subr.bf16.mxu0 %v462_v0  ;;  %355 = vmatprep.subr.bf16.mxu1 %v462_v0  ;;  %p440_p0 = pnand %p439_p13, %p433_p10 }
  0x2b   :  { %336 = vmatpush3.bf16.msra.mxu0 %v379_v5  ;;  %356 = vmatpush3.bf16.msra.mxu1 %v387_v10 }
  0x2c   :  { %337 = vmatprep.subr.bf16.mxu0 %v462_v0  ;;  %357 = vmatprep.subr.bf16.mxu1 %v462_v0 }
  0x2f   :  { %338 = vmatpush3.bf16.msra.mxu0 %v380_v7  ;;  %358 = vmatpush3.bf16.msra.mxu1 %v388_v12 }
  0x30   :  { %339 = vmatprep.subr.bf16.mxu0 %v462_v0  ;;  %359 = vmatprep.subr.bf16.mxu1 %v462_v0 }
  0x33   :  { %340 = vmatpush3.bf16.msra.mxu0 %v381_v9  ;;  %360 = vmatpush3.bf16.msra.mxu1 %v389_v14 }
  0x34   :  { %341 = vmatprep.subr.bf16.mxu0 %v462_v0  ;;  %361 = vmatprep.subr.bf16.mxu1 %v462_v0 }
  0x37   :  { %342 = vmatpush3.bf16.msra.mxu0 %v382_v11  ;;  %362 = vmatpush3.bf16.msra.mxu1 %v390_v16 }
  0x38   :  { %343 = vmatprep.subr.bf16.mxu0 %v462_v0  ;;  %363 = vmatprep.subr.bf16.mxu1 %v462_v0 }
  0x3b   :  { %344 = vmatpush3.bf16.msra.mxu0 %v383_v13  ;;  %364 = vmatpush3.bf16.msra.mxu1 %v391_v17 }
  0x3e   :  { %346 = vmatmul.mubr.bf16.vlgmr.msra.gmra.mxu0 %v50_v15 }
  0xfe   :  { %v156_v19 = vpop.f32.mrf.mxu0 }
  0xff   :  { %v157_v20 = vadd.f32 %v293_v18, %v156_v19 }
 0x100   :  { %v347_v21 = vpop.f32.mrf.mxu0 }
 0x101   :  { %v162_v22 = vmax.f32 %v157_v20, 0.0 }
 0x102   :  { %v159_v23 = vpop.f32.mrf.mxu0 }
 0x103   :  { %v163_v24 = vpack.c.bf16 %v162_v22, %v162_v22 }
 0x104   :  { %v348_v25 = vpop.f32.mrf.mxu0 }
 0x105   :  { %366 = vmatmul.mubr.bf16.vlgmr.msra.gmra.mxu1 %v163_v24 }
 0x1c5   :  { %v269_v27 = vpop.f32.mrf.mxu1 }
 0x1c6   :  { %v270_v28 = vadd.f32 %v302_v26, %v269_v27 }
 0x1c7   :  { %v367_v29 = vpop.f32.mrf.mxu1 }
 0x1c8   :  { %v275_v30 = vmax.f32 %v270_v28, 0.0 }
 0x1c9   :  { %v272_v31 = vpop.f32.mrf.mxu1 }
 0x1ca   :  { %276 = vst [vmem:[#allocation7] sm:$0xff] %v275_v30 }
 0x1cb   :  { %v368_v32 = vpop.f32.mrf.mxu1 }
 0x1cc   :  { %443 = shalt.err (!%p440_p0)
}
 0x1cd   :  { %286 = dma.vmem_to_hbm [thread:$0]  %s284_s9, 128, %s518_s5, [#allocation4]  }
 0x1ce   :  { %456 = dma.done.wait [#allocation4], 128  }
 0x1cf   :  { %457 = vsyncadd [#allocation4], 4294967168 }
 0x1d0   :  { %290 = vsyncpa [#allocation3], 1 }
 0x1d1   :  { %291 = vsyncpa [#allocation6], 1 }
 0x1d2   :  { %292 = vsyncpa [#allocation4], 1 }

</bundles_post_ra>
